<compile_context>
chip_gen: v5e
topology: v5e:2x2
jax: 0.10.0
libtpu: 0.0.40
codegen_flags: <defaults>
</compile_context>

<pallas_src>
import math

import jax
import jax.numpy as jnp
from jax.experimental import pallas as pl
from jax.experimental.pallas import tpu as pltpu


def _sigmoid_f32(z):
    # Exact sigmoid via a single EUP op (tanh); all elementwise math in f32.
    return 0.5 * (jnp.tanh(0.5 * z) + 1.0)


def mlp_kernel(x_ref, w1_ref, b1_ref, w2_ref, b2_ref, w3_ref, b3_ref, o_ref):
    # x_ref: (in_f, tile_n) bf16 -- features on sublanes, rows on lanes.
    # wN_ref: (out_f, in_f) bf16; bN_ref: (out_f, 1) f32, broadcast along lanes.
    x = x_ref[...]
    h1 = _sigmoid_f32(
        jnp.dot(w1_ref[...], x, preferred_element_type=jnp.float32) + b1_ref[...]
    )
    h2 = _sigmoid_f32(
        jnp.dot(w2_ref[...], h1.astype(jnp.bfloat16),
                preferred_element_type=jnp.float32) + b2_ref[...]
    )
    h3 = _sigmoid_f32(
        jnp.dot(w3_ref[...], h2.astype(jnp.bfloat16),
                preferred_element_type=jnp.float32) + b3_ref[...]
    )
    o_ref[...] = h3.astype(o_ref.dtype)


def _round_up(a, b):
    return ((a + b - 1) // b) * b


def _select_tile_n(m, max_tile_n):
    if m <= 128:
        # Single block equal to the full array dims (no (8,128) constraint).
        return m
    # Even number (>=2) of lane tiles so the "parallel" grid axis splits evenly
    # across v7x's two TensorCores; each tile is a multiple of 128 lanes
    # (unmasked full-vreg output stores) and at most max_tile_n.
    # TODO(synk): on v5e/v6e (1 TC) a single larger step is marginally better
    # for small m; make this v7x-conditional if device detection is available.
    pairs = max(1, pl.cdiv(m, 2 * max_tile_n))
    return min(max_tile_n, _round_up(pl.cdiv(m, 2 * pairs), 128))


def mlp_forward_feature_major(x_fm, params, *, max_tile_n=32768):
    """Core entry point. x_fm: (in_f, m) feature-major -> (out_f, m) float32."""
    w1, b1, w2, b2, w3, b3 = params  # w: (out_f, in_f), b: (out_f, 1)
    in_f, m = x_fm.shape
    out_f = w3.shape[0]
    if m == 0:  # empty-batch guard
        return jnp.zeros((out_f, 0), jnp.float32)

    # bf16 MXU operands (f32 accumulation happens inside the kernel).
    x_fm = x_fm.astype(jnp.bfloat16)
    w1b = w1.astype(jnp.bfloat16)
    w2b = w2.astype(jnp.bfloat16)
    w3b = w3.astype(jnp.bfloat16)

    tile_n = _select_tile_n(m, max_tile_n)
    grid = (pl.cdiv(m, tile_n),)  # ragged tail block is masked by Pallas

    return pl.pallas_call(
        mlp_kernel,
        out_shape=jax.ShapeDtypeStruct((out_f, m), jnp.float32),
        grid_spec=pl.GridSpec(
            grid=grid,
            in_specs=[
                # activations: full feature dim, tiled over rows (lanes)
                pl.BlockSpec((in_f, tile_n), lambda i: (0, i)),
                # weights / biases: tiny, same block every grid step
                pl.BlockSpec(w1b.shape, lambda i: (0, 0)),
                pl.BlockSpec(b1.shape, lambda i: (0, 0)),
                pl.BlockSpec(w2b.shape, lambda i: (0, 0)),
                pl.BlockSpec(b2.shape, lambda i: (0, 0)),
                pl.BlockSpec(w3b.shape, lambda i: (0, 0)),
                pl.BlockSpec(b3.shape, lambda i: (0, 0)),
            ],
            out_specs=pl.BlockSpec((out_f, tile_n), lambda i: (0, i)),
        ),
        compiler_params=pltpu.CompilerParams(
            dimension_semantics=("parallel",),
        ),
    )(x_fm, w1b, b1, w2b, b2, w3b, b3)


def mlp_forward(x, params, *, max_tile_n=32768):
    """PyTorch-layout wrapper: x (..., 8) float32 -> (..., 1) float32.

    TODO(synk): in a real pipeline, emit the activations feature-major
    (in_f, m) upstream (or fuse this transpose into the producing op) and call
    mlp_forward_feature_major directly; the transpose below is an extra
    HBM->HBM pass (it at least fuses with the bf16 cast under jit).
    """
    w1, b1, w2, b2, w3, b3 = params
    in_f = w1.shape[1]
    out_f = w3.shape[0]
    lead_shape = x.shape[:-1]
    m = math.prod(lead_shape) if lead_shape else 1
    if m == 0:  # empty-batch guard
        return jnp.zeros((*lead_shape, out_f), jnp.float32)

    x_fm = x.reshape(m, in_f).T  # (in_f, m), fuses with bf16 cast under jit
    out_fm = mlp_forward_feature_major(x_fm, params, max_tile_n=max_tile_n)
    # (out_f, m) -> (..., out_f); out_f == 1 so the transpose is free.
    return out_fm.T.reshape(*lead_shape, out_f)


def init_params(key):
    """torch.nn.Linear-style U(-1/sqrt(fan_in), 1/sqrt(fan_in)) init.

    Weights are kept in the PyTorch (out_features, in_features) orientation
    (exactly what the feature-major kernel wants); biases are (out_features, 1)
    columns so they broadcast along the lane (row) axis inside the kernel.
    """
    dims = [(8, 6), (6, 4), (4, 1)]
    params = []
    for i, (fan_in, fan_out) in enumerate(dims):
        kw, kb = jax.random.split(jax.random.fold_in(key, i))
        bound = 1.0 / (fan_in ** 0.5)
        w = jax.random.uniform(kw, (fan_out, fan_in), jnp.float32, -bound, bound)
        b = jax.random.uniform(kb, (fan_out, 1), jnp.float32, -bound, bound)
        params.extend([w, b])
    return tuple(params)


def reference_forward(x, params):
    w1, b1, w2, b2, w3, b3 = params
    h = jax.nn.sigmoid(x @ w1.T + b1[:, 0])
    h = jax.nn.sigmoid(h @ w2.T + b2[:, 0])
    return jax.nn.sigmoid(h @ w3.T + b3[:, 0])


if __name__ == "__main__":
    key = jax.random.PRNGKey(0)
    params = init_params(key)

    # Multi-dimensional input: (batch=2, groups=4, seq=16, features=8) -> 128 rows.
    x = jax.random.normal(jax.random.fold_in(key, 99), (2, 4, 16, 8), jnp.float32)

    fwd = jax.jit(lambda xx: mlp_forward(xx, params))
    out = jax.block_until_ready(fwd(x))

    ref = reference_forward(x, params)
    assert out.shape == (2, 4, 16, 1), out.shape
    # Tolerance reflects bf16 MXU operand quantization (f32 accumulation,
    # exact f32 sigmoid); observed error is ~1e-3, comfortably inside 1e-2.
    max_err = float(jnp.max(jnp.abs(out - ref)))
    assert max_err < 1e-2, f"mismatch vs reference: max abs err {max_err}"

    print("KERNEL_OK")
</pallas_src>

<mosaic_0001>
module attributes {stable_mosaic.version = 11 : i64} {
  func.func @mlp_kernel(%arg0: i32, %arg1: memref<8x128xbf16, #tpu.memory_space<vmem>>, %arg2: memref<6x8xbf16, #tpu.memory_space<vmem>>, %arg3: memref<6x1xf32, #tpu.memory_space<vmem>>, %arg4: memref<4x6xbf16, #tpu.memory_space<vmem>>, %arg5: memref<4x1xf32, #tpu.memory_space<vmem>>, %arg6: memref<1x4xbf16, #tpu.memory_space<vmem>>, %arg7: memref<1x1xf32, #tpu.memory_space<vmem>>, %arg8: memref<1x128xf32, #tpu.memory_space<vmem>>) attributes {dimension_semantics = [#tpu.dimension_semantics<parallel>], iteration_bounds = array<i64: 1>, scalar_prefetch = 0 : i64, scratch_operands = 0 : i64, tpu.core_type = #tpu.core_type<tc>, window_params = [{transform_indices = @transform_0, window_bounds = array<i64: 8, 128>}, {pipeline_mode = #tpu.pipeline_mode<synchronous>, transform_indices = @transform_1, window_bounds = array<i64: 6, 8>}, {pipeline_mode = #tpu.pipeline_mode<synchronous>, transform_indices = @transform_2, window_bounds = array<i64: 6, 1>}, {pipeline_mode = #tpu.pipeline_mode<synchronous>, transform_indices = @transform_3, window_bounds = array<i64: 4, 6>}, {pipeline_mode = #tpu.pipeline_mode<synchronous>, transform_indices = @transform_4, window_bounds = array<i64: 4, 1>}, {pipeline_mode = #tpu.pipeline_mode<synchronous>, transform_indices = @transform_5, window_bounds = array<i64: 1, 4>}, {pipeline_mode = #tpu.pipeline_mode<synchronous>, transform_indices = @transform_6, window_bounds = array<i64: 1, 1>}, {transform_indices = @transform_7, window_bounds = array<i64: 1, 128>}]} {
    %c0 = arith.constant 0 : index
    %c0_0 = arith.constant 0 : index
    %0 = vector.load %arg1[%c0, %c0_0] : memref<8x128xbf16, #tpu.memory_space<vmem>>, vector<8x128xbf16>
    %c0_1 = arith.constant 0 : index
    %c0_2 = arith.constant 0 : index
    %1 = vector.load %arg2[%c0_1, %c0_2] : memref<6x8xbf16, #tpu.memory_space<vmem>>, vector<6x8xbf16>
    %cst = arith.constant dense<0.000000e+00> : vector<6x128xf32>
    %2 = tpu.matmul %1, %0, %cst {dimension_numbers = #tpu.dot_dimension_numbers<[1], [0], [0], [1], [0, 0, 1, 1], [], []>} : vector<6x8xbf16>, vector<8x128xbf16>, vector<6x128xf32> -> vector<6x128xf32>
    %c0_3 = arith.constant 0 : index
    %c0_4 = arith.constant 0 : index
    %3 = vector.load %arg3[%c0_3, %c0_4] : memref<6x1xf32, #tpu.memory_space<vmem>>, vector<6x1xf32>
    %4 = vector.broadcast %3 : vector<6x1xf32> to vector<6x128xf32>
    %5 = arith.addf %2, %4 : vector<6x128xf32>
    %cst_5 = arith.constant 5.000000e-01 : f32
    %6 = vector.broadcast %cst_5 : f32 to vector<6x128xf32>
    %7 = arith.mulf %6, %5 : vector<6x128xf32>
    %8 = math.tanh %7 : vector<6x128xf32>
    %cst_6 = arith.constant 1.000000e+00 : f32
    %9 = vector.broadcast %cst_6 : f32 to vector<6x128xf32>
    %10 = arith.addf %8, %9 : vector<6x128xf32>
    %cst_7 = arith.constant 5.000000e-01 : f32
    %11 = vector.broadcast %cst_7 : f32 to vector<6x128xf32>
    %12 = arith.mulf %11, %10 : vector<6x128xf32>
    %c0_8 = arith.constant 0 : index
    %c0_9 = arith.constant 0 : index
    %13 = vector.load %arg4[%c0_8, %c0_9] : memref<4x6xbf16, #tpu.memory_space<vmem>>, vector<4x6xbf16>
    %14 = arith.truncf %12 : vector<6x128xf32> to vector<6x128xbf16>
    %cst_10 = arith.constant dense<0.000000e+00> : vector<4x128xf32>
    %15 = tpu.matmul %13, %14, %cst_10 {dimension_numbers = #tpu.dot_dimension_numbers<[1], [0], [0], [1], [0, 0, 1, 1], [], []>} : vector<4x6xbf16>, vector<6x128xbf16>, vector<4x128xf32> -> vector<4x128xf32>
    %c0_11 = arith.constant 0 : index
    %c0_12 = arith.constant 0 : index
    %16 = vector.load %arg5[%c0_11, %c0_12] : memref<4x1xf32, #tpu.memory_space<vmem>>, vector<4x1xf32>
    %17 = vector.broadcast %16 : vector<4x1xf32> to vector<4x128xf32>
    %18 = arith.addf %15, %17 : vector<4x128xf32>
    %cst_13 = arith.constant 5.000000e-01 : f32
    %19 = vector.broadcast %cst_13 : f32 to vector<4x128xf32>
    %20 = arith.mulf %19, %18 : vector<4x128xf32>
    %21 = math.tanh %20 : vector<4x128xf32>
    %cst_14 = arith.constant 1.000000e+00 : f32
    %22 = vector.broadcast %cst_14 : f32 to vector<4x128xf32>
    %23 = arith.addf %21, %22 : vector<4x128xf32>
    %cst_15 = arith.constant 5.000000e-01 : f32
    %24 = vector.broadcast %cst_15 : f32 to vector<4x128xf32>
    %25 = arith.mulf %24, %23 : vector<4x128xf32>
    %c0_16 = arith.constant 0 : index
    %c0_17 = arith.constant 0 : index
    %26 = vector.load %arg6[%c0_16, %c0_17] : memref<1x4xbf16, #tpu.memory_space<vmem>>, vector<1x4xbf16>
    %27 = arith.truncf %25 : vector<4x128xf32> to vector<4x128xbf16>
    %cst_18 = arith.constant dense<0.000000e+00> : vector<1x128xf32>
    %28 = tpu.matmul %26, %27, %cst_18 {dimension_numbers = #tpu.dot_dimension_numbers<[1], [0], [0], [1], [0, 0, 1, 1], [], []>} : vector<1x4xbf16>, vector<4x128xbf16>, vector<1x128xf32> -> vector<1x128xf32>
    %c0_19 = arith.constant 0 : index
    %c0_20 = arith.constant 0 : index
    %29 = vector.load %arg7[%c0_19, %c0_20] : memref<1x1xf32, #tpu.memory_space<vmem>>, vector<1x1xf32>
    %30 = vector.broadcast %29 : vector<1x1xf32> to vector<1x128xf32>
    %31 = arith.addf %28, %30 : vector<1x128xf32>
    %cst_21 = arith.constant 5.000000e-01 : f32
    %32 = vector.broadcast %cst_21 : f32 to vector<1x128xf32>
    %33 = arith.mulf %32, %31 : vector<1x128xf32>
    %34 = math.tanh %33 : vector<1x128xf32>
    %cst_22 = arith.constant 1.000000e+00 : f32
    %35 = vector.broadcast %cst_22 : f32 to vector<1x128xf32>
    %36 = arith.addf %34, %35 : vector<1x128xf32>
    %cst_23 = arith.constant 5.000000e-01 : f32
    %37 = vector.broadcast %cst_23 : f32 to vector<1x128xf32>
    %38 = arith.mulf %37, %36 : vector<1x128xf32>
    %c0_24 = arith.constant 0 : index
    %c0_25 = arith.constant 0 : index
    %39 = vector.load %arg8[%c0_24, %c0_25] : memref<1x128xf32, #tpu.memory_space<vmem>>, vector<1x128xf32>
    tpu.vector_store %arg8[%c0_24, %c0_25], %38 {strides = array<i32>} : memref<1x128xf32, #tpu.memory_space<vmem>>, vector<1x128xf32>,
    return
  }
  func.func @transform_0(%arg0: i32) -> (i32, i32) {
    %c0_i32 = arith.constant 0 : i32
    %c0_i32_0 = arith.constant 0 : i32
    return %c0_i32, %arg0 : i32, i32
  }
  func.func @transform_1(%arg0: i32) -> (i32, i32) {
    %c0_i32 = arith.constant 0 : i32
    %c0_i32_0 = arith.constant 0 : i32
    %c0_i32_1 = arith.constant 0 : i32
    return %c0_i32, %c0_i32_0 : i32, i32
  }
  func.func @transform_2(%arg0: i32) -> (i32, i32) {
    %c0_i32 = arith.constant 0 : i32
    %c0_i32_0 = arith.constant 0 : i32
    %c0_i32_1 = arith.constant 0 : i32
    return %c0_i32, %c0_i32_0 : i32, i32
  }
  func.func @transform_3(%arg0: i32) -> (i32, i32) {
    %c0_i32 = arith.constant 0 : i32
    %c0_i32_0 = arith.constant 0 : i32
    %c0_i32_1 = arith.constant 0 : i32
    return %c0_i32, %c0_i32_0 : i32, i32
  }
  func.func @transform_4(%arg0: i32) -> (i32, i32) {
    %c0_i32 = arith.constant 0 : i32
    %c0_i32_0 = arith.constant 0 : i32
    %c0_i32_1 = arith.constant 0 : i32
    return %c0_i32, %c0_i32_0 : i32, i32
  }
  func.func @transform_5(%arg0: i32) -> (i32, i32) {
    %c0_i32 = arith.constant 0 : i32
    %c0_i32_0 = arith.constant 0 : i32
    %c0_i32_1 = arith.constant 0 : i32
    return %c0_i32, %c0_i32_0 : i32, i32
  }
  func.func @transform_6(%arg0: i32) -> (i32, i32) {
    %c0_i32 = arith.constant 0 : i32
    %c0_i32_0 = arith.constant 0 : i32
    %c0_i32_1 = arith.constant 0 : i32
    return %c0_i32, %c0_i32_0 : i32, i32
  }
  func.func @transform_7(%arg0: i32) -> (i32, i32) {
    %c0_i32 = arith.constant 0 : i32
    %c0_i32_0 = arith.constant 0 : i32
    return %c0_i32, %arg0 : i32, i32
  }
}

</mosaic_0001>

<bundles_post_ra>
// kernel: _lambda_.1
= control target key start
LH: loop header
LB: loop body
LE: loop exit
PB: predicated region body
PF: predicated region fallthrough
CT: control target
= control target key end

     0   :  { %vm41_vm0 = vcmask 1043456   ;;  %v146_v1 = vmov 0   ;;  %vm37_vm1 = vcmask 64512   ;;  %vm74_vm2 = vcmask 1042432   ;;  %s211_s0 = inlined_call_operand.vmem [shape: bf16[8,128], index: 0, kind: input, shape index: {}]   ;;  %s212_s1 = inlined_call_operand.vmem [shape: bf16[6,8], index: 1, kind: input, shape index: {}]   ;;  %s213_s2 = inlined_call_operand.vmem [shape: f32[6,1], index: 2, kind: input, shape index: {}]   ;;  %s214_s4 = inlined_call_operand.vmem [shape: f32[4,1], index: 4, kind: input, shape index: {}]   ;;  %s215_s3 = inlined_call_operand.vmem [shape: bf16[4,6], index: 3, kind: input, shape index: {}]   ;;  %s216_s6 = inlined_call_operand.<no memory space> [shape: f32[1,1], index: 6, kind: input, shape index: {}]   ;;  %s217_s5 = inlined_call_operand.vmem [shape: bf16[1,4], index: 5, kind: input, shape index: {}]   ;;  %s218_s7 = inlined_call_operand.vmem [shape: f32[1,128], index: 7, kind: output, shape index: {}]  }
   0x1   :  { %v29_v0 = vld [vmem:[%s211_s0] sm:$0xf]  ;;  %138 = vset.pattern.permute.xlu0 %v146_v1  ;;  %139 = vset.pattern.permute.xlu1 %v146_v1  ;;  %vm70_vm3 = vcmask 48128   ;;  %v12_v17 = vstv %s216_s6  ;;  %vm108_vm4 = vcmask 1041408   ;;  %vm104_vm5 = vcmask 31744  }
   0x2   :  { %v31_v2 = vld [vmem:[%s213_s2] sm:$0x3f]  ;;  %v43_v3 = vsel %vm41_vm0, %v29_v0, 0  ;;  %13 = vst [vmem:[#allocation2] sm:$0x1] %v12_v17 }
   0x3   :  { %34 = vperm.xlu0 %138, %v31_v2   ;;  %52 = vmatpush.bf16.msra.mxu0 %v43_v3  ;;  %v30_v4 = vld [vmem:[%s212_s1] sm:$0x7] }
   0x4   :  { %v64_v5 = vld [vmem:[%s214_s4] sm:$0xf] }
   0x5   :  { %v62_v16 = vld [vmem:[%s215_s3] sm:$0x3] }
   0x6   :  { %134 = vmatmul.msk.bf16.vlgmr.msra.gmra.mxu0 %vm37_vm1, %v30_v4  ;;  %v95_v29 = vld [vmem:[%s217_s5] sm:$0x1] }
   0x9   :  { %v97_v18 = vld [vmem:[#allocation2] sm:$0x1] }
   0xa   :  { %100 = vperm.xlu1 %139, %v97_v18  }
   0xb   :  { %67 = vperm.xlu0 %138, %v64_v5  }
  0x75   :  { %v35_v6 = vpop.permute.xlu0 %34 }
  0x7c   :  { %v101_v30 = vpop.permute.xlu1 %100 }
  0x7d   :  { %v68_v19 = vpop.permute.xlu0 %67  ;;  %v103_v31 = vperm.slane %v101_v30, 0 }
  0x83   :  { %v54_v7 = vpop.f32.mrf.mxu0 }
  0x84   :  { %v55_v8 = vadd.f32 %v54_v7, %v35_v6 }
  0x86   :  { %v58_v9 = vmul.f32 0.5, %v55_v8 }
  0x88   :  { %140 = vtanh.f32 %v58_v9 }
  0x8b   :  { %v56_v10 = vpop.f32.mrf.mxu0 }
  0x8e   :  { %v141_v11 = vpop.eup %140 }
  0x8f   :  { %v60_v12 = vadd.f32 1.0, %v141_v11 }
  0x91   :  { %v61_v13 = vmul.f32 0.5, %v60_v12 }
  0x93   :  { %v63_v14 = vpack.c.bf16 %v61_v13, %v61_v13 }
  0x95   :  { %v76_v15 = vsel %vm74_vm2, %v63_v14, 0 }
  0x96   :  { %85 = vmatpush.bf16.msra.mxu1 %v76_v15 }
  0x99   :  { %135 = vmatmul.msk.bf16.vlgmr.msra.gmra.mxu1 %vm70_vm3, %v62_v16 }
 0x116   :  { %v87_v20 = vpop.f32.mrf.mxu1 }
 0x117   :  { %v88_v21 = vadd.f32 %v87_v20, %v68_v19 }
 0x119   :  { %v91_v22 = vmul.f32 0.5, %v88_v21 }
 0x11b   :  { %142 = vtanh.f32 %v91_v22 }
 0x11e   :  { %v89_v23 = vpop.f32.mrf.mxu1 }
 0x121   :  { %v143_v24 = vpop.eup %142 }
 0x122   :  { %v93_v25 = vadd.f32 1.0, %v143_v24 }
 0x124   :  { %v94_v26 = vmul.f32 0.5, %v93_v25 }
 0x126   :  { %v96_v27 = vpack.c.bf16 %v94_v26, %v94_v26 }
 0x128   :  { %v110_v28 = vsel %vm108_vm4, %v96_v27, 0 }
 0x129   :  { %119 = vmatpush.bf16.msra.mxu2 %v110_v28 }
 0x12c   :  { %136 = vmatmul.msk.bf16.vlgmr.msra.gmra.mxu2 %vm104_vm5, %v95_v29 }
 0x1af   :  { %v121_v32 = vpop.f32.mrf.mxu2 }
 0x1b0   :  { %v122_v33 = vadd.f32 %v121_v32, %v103_v31 }
 0x1b2   :  { %v125_v34 = vmul.f32 0.5, %v122_v33 }
 0x1b4   :  { %144 = vtanh.f32 %v125_v34 }
 0x1b7   :  { %v123_v35 = vpop.f32.mrf.mxu2 }
 0x1ba   :  { %v145_v36 = vpop.eup %144 }
 0x1bb   :  { %v127_v37 = vadd.f32 1.0, %v145_v36 }
 0x1bd   :  { %v128_v38 = vmul.f32 0.5, %v127_v37 }
 0x1bf   :  { %129 = vst [vmem:[%s218_s7] sm:$0x1] %v128_v38 }

</bundles_post_ra>
